<compile_context>
chip_gen: v7x
topology: tpu7x:2x2x1
jax: 0.10.0
libtpu: 0.0.40
codegen_flags: <defaults>
</compile_context>

<pallas_src>
import functools

import jax
import jax.numpy as jnp
from jax.experimental import pallas as pl
from jax.experimental.pallas import tpu as pltpu

HIDDEN = 20
LANES = 128    # TPU lane width
CHUNK = 128    # rows per register-resident sub-chunk (16 vregs x + 16 vregs acc)


def _round_up(a, b):
    return ((a + b - 1) // b) * b


def _accumulate(params_ref, x, acc):
    """acc += relu(x*w1[j] + b1[j]) * w2[j] for all 20 hidden units (VPU only)."""
    for j in range(HIDDEN):
        h = jnp.maximum(x * params_ref[j] + params_ref[HIDDEN + j], 0.0)
        acc = acc + h * params_ref[2 * HIDDEN + j]
    return acc


def mlp_kernel(params_ref, x_ref, o_ref):
    # params_ref: SMEM f32[61] = w1(20) | b1(20) | w2(20) | b2(1)
    # x_ref / o_ref: (block_rows, 128) lane-dense batch tiles in VMEM.
    block_rows, lanes = x_ref.shape
    b2 = params_ref[3 * HIDDEN]

    if block_rows <= CHUNK:
        # Small block: whole tile fits comfortably in vregs.
        x = x_ref[...]
        o_ref[...] = _accumulate(params_ref, x, jnp.full_like(x, b2))
    else:
        # Large block: walk register-resident 128-row chunks so x and acc never
        # spill to VMEM (hidden-unit unroll is innermost).
        assert block_rows % CHUNK == 0, "block_rows must be a multiple of CHUNK"
        n_chunks = block_rows // CHUNK
        acc0 = jnp.full((CHUNK, lanes), b2, dtype=jnp.float32)  # hoisted splat

        def body(c, carry):
            r0 = pl.multiple_of(c * CHUNK, CHUNK)
            x = x_ref[pl.ds(r0, CHUNK), :]
            o_ref[pl.ds(r0, CHUNK), :] = _accumulate(params_ref, x, acc0)
            return carry

        jax.lax.fori_loop(0, n_chunks, body, 0, unroll=True)


@functools.partial(jax.jit, static_argnames=("block_rows",))
def net_forward(x, w1, b1, w2, b2, *, block_rows=2048):
    """x: (N, 1) float32. Returns (N, 1) float32. Matches relu(x@W1.T+b1)@W2.T+b2."""
    n = x.shape[0]
    x_flat = x.reshape(-1).astype(jnp.float32)

    # Lane-dense layout: pad only to full (8,128) vregs (NOT to a block multiple;
    # the ragged last grid block is handled by Pallas and its writes discarded).
    rows = _round_up(pl.cdiv(n, LANES), 8)
    n_pad = rows * LANES
    if n_pad != n:
        x_flat = jnp.pad(x_flat, (0, n_pad - n))
    x2d = x_flat.reshape(rows, LANES)

    if rows <= CHUNK:
        # Tiny problem: one small block (single vreg-scale work; grid split is moot).
        block_rows = rows
    else:
        # Multiple of CHUNK, at least 2 grid blocks (v7x megacore), capped at the
        # requested block size.  2048 rows * 128 * 4 B = 1 MiB per tile -> far
        # under v7x's 32 MiB scoped-VMEM default even double-buffered.
        block_rows = _round_up(block_rows, CHUNK)
        block_rows = min(block_rows, _round_up(pl.cdiv(rows, 2), CHUNK))
        block_rows = max(block_rows, CHUNK)
    num_blocks = pl.cdiv(rows, block_rows)

    # Single packed SMEM prefetch vector: [w1 | b1 | w2 | b2].
    params = jnp.concatenate([
        w1.reshape(HIDDEN).astype(jnp.float32),   # Linear(1,20).weight (20,1) -> (20,)
        b1.reshape(HIDDEN).astype(jnp.float32),
        w2.reshape(HIDDEN).astype(jnp.float32),   # Linear(20,1).weight (1,20) -> (20,)
        b2.reshape(1).astype(jnp.float32),
    ])

    out2d = pl.pallas_call(
        mlp_kernel,
        out_shape=jax.ShapeDtypeStruct((rows, LANES), jnp.float32),
        grid_spec=pltpu.PrefetchScalarGridSpec(
            num_scalar_prefetch=1,
            grid=(num_blocks,),
            in_specs=[
                pl.BlockSpec((block_rows, LANES), lambda i, *_: (i, 0)),   # x tile
            ],
            out_specs=pl.BlockSpec((block_rows, LANES), lambda i, *_: (i, 0)),
        ),
        compiler_params=pltpu.CompilerParams(
            dimension_semantics=("parallel",)),
    )(params, x2d)

    return out2d.reshape(-1)[:n].reshape(n, 1)


def init_params(key):
    """Deterministic init mimicking torch.nn.Linear's U(-1/sqrt(fan_in), +1/sqrt(fan_in))."""
    k1, k2, k3, k4 = jax.random.split(key, 4)
    bound1 = 1.0 / jnp.sqrt(1.0)    # fan_in = 1
    bound2 = 1.0 / jnp.sqrt(20.0)   # fan_in = 20
    w1 = jax.random.uniform(k1, (HIDDEN, 1), jnp.float32, -bound1, bound1)
    b1 = jax.random.uniform(k2, (HIDDEN,), jnp.float32, -bound1, bound1)
    w2 = jax.random.uniform(k3, (1, HIDDEN), jnp.float32, -bound2, bound2)
    b2 = jax.random.uniform(k4, (1,), jnp.float32, -bound2, bound2)
    return w1, b1, w2, b2


if __name__ == "__main__":
    key = jax.random.PRNGKey(0)
    w1, b1, w2, b2 = init_params(key)

    # Matches the script: torch.unsqueeze(torch.linspace(-1, 1, 1000), dim=1)
    N = 1000
    x = jnp.linspace(-1.0, 1.0, N, dtype=jnp.float32).reshape(N, 1)
    out = jax.block_until_ready(net_forward(x, w1, b1, w2, b2))
    ref = jnp.maximum(x @ w1.T + b1, 0.0) @ w2.T + b2
    assert out.shape == (N, 1)
    assert jnp.allclose(out, ref, atol=1e-5, rtol=1e-5)

    # Second (still small) case exercising the multi-block grid, the ragged
    # last block, and the in-kernel chunked path.
    N2 = 33_000
    x2 = jax.random.uniform(jax.random.PRNGKey(1), (N2, 1), jnp.float32, -1.0, 1.0)
    out2 = jax.block_until_ready(net_forward(x2, w1, b1, w2, b2))
    ref2 = jnp.maximum(x2 @ w1.T + b1, 0.0) @ w2.T + b2
    assert out2.shape == (N2, 1)
    assert jnp.allclose(out2, ref2, atol=1e-5, rtol=1e-5)

    print("KERNEL_OK")
</pallas_src>

<mosaic_0001>
module attributes {stable_mosaic.version = 11 : i64} {
  func.func @mlp_kernel(%arg0: i32, %arg1: memref<61xf32, #tpu.memory_space<smem>>, %arg2: memref<8x128xf32, #tpu.memory_space<vmem>>, %arg3: memref<8x128xf32, #tpu.memory_space<vmem>>) attributes {dimension_semantics = [#tpu.dimension_semantics<parallel>], iteration_bounds = array<i64: 1>, scalar_prefetch = 1 : i64, scratch_operands = 0 : i64, tpu.core_type = #tpu.core_type<tc>, window_params = [{transform_indices = @transform_0, window_bounds = array<i64: 8, 128>}, {transform_indices = @transform_1, window_bounds = array<i64: 8, 128>}]} {
    %c60 = arith.constant 60 : index
    %0 = memref.load %arg1[%c60] : memref<61xf32, #tpu.memory_space<smem>>
    %c0 = arith.constant 0 : index
    %c0_0 = arith.constant 0 : index
    %1 = vector.load %arg2[%c0, %c0_0] : memref<8x128xf32, #tpu.memory_space<vmem>>, vector<8x128xf32>
    %2 = vector.broadcast %0 : f32 to vector<8x128xf32>
    %c0_1 = arith.constant 0 : index
    %3 = memref.load %arg1[%c0_1] : memref<61xf32, #tpu.memory_space<smem>>
    %4 = vector.broadcast %3 : f32 to vector<8x128xf32>
    %5 = arith.mulf %1, %4 : vector<8x128xf32>
    %c20 = arith.constant 20 : index
    %6 = memref.load %arg1[%c20] : memref<61xf32, #tpu.memory_space<smem>>
    %7 = vector.broadcast %6 : f32 to vector<8x128xf32>
    %8 = arith.addf %5, %7 : vector<8x128xf32>
    %cst = arith.constant 0.000000e+00 : f32
    %9 = vector.broadcast %cst : f32 to vector<8x128xf32>
    %10 = arith.maximumf %8, %9 : vector<8x128xf32>
    %c40 = arith.constant 40 : index
    %11 = memref.load %arg1[%c40] : memref<61xf32, #tpu.memory_space<smem>>
    %12 = vector.broadcast %11 : f32 to vector<8x128xf32>
    %13 = arith.mulf %10, %12 : vector<8x128xf32>
    %14 = arith.addf %2, %13 : vector<8x128xf32>
    %c1 = arith.constant 1 : index
    %15 = memref.load %arg1[%c1] : memref<61xf32, #tpu.memory_space<smem>>
    %16 = vector.broadcast %15 : f32 to vector<8x128xf32>
    %17 = arith.mulf %1, %16 : vector<8x128xf32>
    %c21 = arith.constant 21 : index
    %18 = memref.load %arg1[%c21] : memref<61xf32, #tpu.memory_space<smem>>
    %19 = vector.broadcast %18 : f32 to vector<8x128xf32>
    %20 = arith.addf %17, %19 : vector<8x128xf32>
    %cst_2 = arith.constant 0.000000e+00 : f32
    %21 = vector.broadcast %cst_2 : f32 to vector<8x128xf32>
    %22 = arith.maximumf %20, %21 : vector<8x128xf32>
    %c41 = arith.constant 41 : index
    %23 = memref.load %arg1[%c41] : memref<61xf32, #tpu.memory_space<smem>>
    %24 = vector.broadcast %23 : f32 to vector<8x128xf32>
    %25 = arith.mulf %22, %24 : vector<8x128xf32>
    %26 = arith.addf %14, %25 : vector<8x128xf32>
    %c2 = arith.constant 2 : index
    %27 = memref.load %arg1[%c2] : memref<61xf32, #tpu.memory_space<smem>>
    %28 = vector.broadcast %27 : f32 to vector<8x128xf32>
    %29 = arith.mulf %1, %28 : vector<8x128xf32>
    %c22 = arith.constant 22 : index
    %30 = memref.load %arg1[%c22] : memref<61xf32, #tpu.memory_space<smem>>
    %31 = vector.broadcast %30 : f32 to vector<8x128xf32>
    %32 = arith.addf %29, %31 : vector<8x128xf32>
    %cst_3 = arith.constant 0.000000e+00 : f32
    %33 = vector.broadcast %cst_3 : f32 to vector<8x128xf32>
    %34 = arith.maximumf %32, %33 : vector<8x128xf32>
    %c42 = arith.constant 42 : index
    %35 = memref.load %arg1[%c42] : memref<61xf32, #tpu.memory_space<smem>>
    %36 = vector.broadcast %35 : f32 to vector<8x128xf32>
    %37 = arith.mulf %34, %36 : vector<8x128xf32>
    %38 = arith.addf %26, %37 : vector<8x128xf32>
    %c3 = arith.constant 3 : index
    %39 = memref.load %arg1[%c3] : memref<61xf32, #tpu.memory_space<smem>>
    %40 = vector.broadcast %39 : f32 to vector<8x128xf32>
    %41 = arith.mulf %1, %40 : vector<8x128xf32>
    %c23 = arith.constant 23 : index
    %42 = memref.load %arg1[%c23] : memref<61xf32, #tpu.memory_space<smem>>
    %43 = vector.broadcast %42 : f32 to vector<8x128xf32>
    %44 = arith.addf %41, %43 : vector<8x128xf32>
    %cst_4 = arith.constant 0.000000e+00 : f32
    %45 = vector.broadcast %cst_4 : f32 to vector<8x128xf32>
    %46 = arith.maximumf %44, %45 : vector<8x128xf32>
    %c43 = arith.constant 43 : index
    %47 = memref.load %arg1[%c43] : memref<61xf32, #tpu.memory_space<smem>>
    %48 = vector.broadcast %47 : f32 to vector<8x128xf32>
    %49 = arith.mulf %46, %48 : vector<8x128xf32>
    %50 = arith.addf %38, %49 : vector<8x128xf32>
    %c4 = arith.constant 4 : index
    %51 = memref.load %arg1[%c4] : memref<61xf32, #tpu.memory_space<smem>>
    %52 = vector.broadcast %51 : f32 to vector<8x128xf32>
    %53 = arith.mulf %1, %52 : vector<8x128xf32>
    %c24 = arith.constant 24 : index
    %54 = memref.load %arg1[%c24] : memref<61xf32, #tpu.memory_space<smem>>
    %55 = vector.broadcast %54 : f32 to vector<8x128xf32>
    %56 = arith.addf %53, %55 : vector<8x128xf32>
    %cst_5 = arith.constant 0.000000e+00 : f32
    %57 = vector.broadcast %cst_5 : f32 to vector<8x128xf32>
    %58 = arith.maximumf %56, %57 : vector<8x128xf32>
    %c44 = arith.constant 44 : index
    %59 = memref.load %arg1[%c44] : memref<61xf32, #tpu.memory_space<smem>>
    %60 = vector.broadcast %59 : f32 to vector<8x128xf32>
    %61 = arith.mulf %58, %60 : vector<8x128xf32>
    %62 = arith.addf %50, %61 : vector<8x128xf32>
    %c5 = arith.constant 5 : index
    %63 = memref.load %arg1[%c5] : memref<61xf32, #tpu.memory_space<smem>>
    %64 = vector.broadcast %63 : f32 to vector<8x128xf32>
    %65 = arith.mulf %1, %64 : vector<8x128xf32>
    %c25 = arith.constant 25 : index
    %66 = memref.load %arg1[%c25] : memref<61xf32, #tpu.memory_space<smem>>
    %67 = vector.broadcast %66 : f32 to vector<8x128xf32>
    %68 = arith.addf %65, %67 : vector<8x128xf32>
    %cst_6 = arith.constant 0.000000e+00 : f32
    %69 = vector.broadcast %cst_6 : f32 to vector<8x128xf32>
    %70 = arith.maximumf %68, %69 : vector<8x128xf32>
    %c45 = arith.constant 45 : index
    %71 = memref.load %arg1[%c45] : memref<61xf32, #tpu.memory_space<smem>>
    %72 = vector.broadcast %71 : f32 to vector<8x128xf32>
    %73 = arith.mulf %70, %72 : vector<8x128xf32>
    %74 = arith.addf %62, %73 : vector<8x128xf32>
    %c6 = arith.constant 6 : index
    %75 = memref.load %arg1[%c6] : memref<61xf32, #tpu.memory_space<smem>>
    %76 = vector.broadcast %75 : f32 to vector<8x128xf32>
    %77 = arith.mulf %1, %76 : vector<8x128xf32>
    %c26 = arith.constant 26 : index
    %78 = memref.load %arg1[%c26] : memref<61xf32, #tpu.memory_space<smem>>
    %79 = vector.broadcast %78 : f32 to vector<8x128xf32>
    %80 = arith.addf %77, %79 : vector<8x128xf32>
    %cst_7 = arith.constant 0.000000e+00 : f32
    %81 = vector.broadcast %cst_7 : f32 to vector<8x128xf32>
    %82 = arith.maximumf %80, %81 : vector<8x128xf32>
    %c46 = arith.constant 46 : index
    %83 = memref.load %arg1[%c46] : memref<61xf32, #tpu.memory_space<smem>>
    %84 = vector.broadcast %83 : f32 to vector<8x128xf32>
    %85 = arith.mulf %82, %84 : vector<8x128xf32>
    %86 = arith.addf %74, %85 : vector<8x128xf32>
    %c7 = arith.constant 7 : index
    %87 = memref.load %arg1[%c7] : memref<61xf32, #tpu.memory_space<smem>>
    %88 = vector.broadcast %87 : f32 to vector<8x128xf32>
    %89 = arith.mulf %1, %88 : vector<8x128xf32>
    %c27 = arith.constant 27 : index
    %90 = memref.load %arg1[%c27] : memref<61xf32, #tpu.memory_space<smem>>
    %91 = vector.broadcast %90 : f32 to vector<8x128xf32>
    %92 = arith.addf %89, %91 : vector<8x128xf32>
    %cst_8 = arith.constant 0.000000e+00 : f32
    %93 = vector.broadcast %cst_8 : f32 to vector<8x128xf32>
    %94 = arith.maximumf %92, %93 : vector<8x128xf32>
    %c47 = arith.constant 47 : index
    %95 = memref.load %arg1[%c47] : memref<61xf32, #tpu.memory_space<smem>>
    %96 = vector.broadcast %95 : f32 to vector<8x128xf32>
    %97 = arith.mulf %94, %96 : vector<8x128xf32>
    %98 = arith.addf %86, %97 : vector<8x128xf32>
    %c8 = arith.constant 8 : index
    %99 = memref.load %arg1[%c8] : memref<61xf32, #tpu.memory_space<smem>>
    %100 = vector.broadcast %99 : f32 to vector<8x128xf32>
    %101 = arith.mulf %1, %100 : vector<8x128xf32>
    %c28 = arith.constant 28 : index
    %102 = memref.load %arg1[%c28] : memref<61xf32, #tpu.memory_space<smem>>
    %103 = vector.broadcast %102 : f32 to vector<8x128xf32>
    %104 = arith.addf %101, %103 : vector<8x128xf32>
    %cst_9 = arith.constant 0.000000e+00 : f32
    %105 = vector.broadcast %cst_9 : f32 to vector<8x128xf32>
    %106 = arith.maximumf %104, %105 : vector<8x128xf32>
    %c48 = arith.constant 48 : index
    %107 = memref.load %arg1[%c48] : memref<61xf32, #tpu.memory_space<smem>>
    %108 = vector.broadcast %107 : f32 to vector<8x128xf32>
    %109 = arith.mulf %106, %108 : vector<8x128xf32>
    %110 = arith.addf %98, %109 : vector<8x128xf32>
    %c9 = arith.constant 9 : index
    %111 = memref.load %arg1[%c9] : memref<61xf32, #tpu.memory_space<smem>>
    %112 = vector.broadcast %111 : f32 to vector<8x128xf32>
    %113 = arith.mulf %1, %112 : vector<8x128xf32>
    %c29 = arith.constant 29 : index
    %114 = memref.load %arg1[%c29] : memref<61xf32, #tpu.memory_space<smem>>
    %115 = vector.broadcast %114 : f32 to vector<8x128xf32>
    %116 = arith.addf %113, %115 : vector<8x128xf32>
    %cst_10 = arith.constant 0.000000e+00 : f32
    %117 = vector.broadcast %cst_10 : f32 to vector<8x128xf32>
    %118 = arith.maximumf %116, %117 : vector<8x128xf32>
    %c49 = arith.constant 49 : index
    %119 = memref.load %arg1[%c49] : memref<61xf32, #tpu.memory_space<smem>>
    %120 = vector.broadcast %119 : f32 to vector<8x128xf32>
    %121 = arith.mulf %118, %120 : vector<8x128xf32>
    %122 = arith.addf %110, %121 : vector<8x128xf32>
    %c10 = arith.constant 10 : index
    %123 = memref.load %arg1[%c10] : memref<61xf32, #tpu.memory_space<smem>>
    %124 = vector.broadcast %123 : f32 to vector<8x128xf32>
    %125 = arith.mulf %1, %124 : vector<8x128xf32>
    %c30 = arith.constant 30 : index
    %126 = memref.load %arg1[%c30] : memref<61xf32, #tpu.memory_space<smem>>
    %127 = vector.broadcast %126 : f32 to vector<8x128xf32>
    %128 = arith.addf %125, %127 : vector<8x128xf32>
    %cst_11 = arith.constant 0.000000e+00 : f32
    %129 = vector.broadcast %cst_11 : f32 to vector<8x128xf32>
    %130 = arith.maximumf %128, %129 : vector<8x128xf32>
    %c50 = arith.constant 50 : index
    %131 = memref.load %arg1[%c50] : memref<61xf32, #tpu.memory_space<smem>>
    %132 = vector.broadcast %131 : f32 to vector<8x128xf32>
    %133 = arith.mulf %130, %132 : vector<8x128xf32>
    %134 = arith.addf %122, %133 : vector<8x128xf32>
    %c11 = arith.constant 11 : index
    %135 = memref.load %arg1[%c11] : memref<61xf32, #tpu.memory_space<smem>>
    %136 = vector.broadcast %135 : f32 to vector<8x128xf32>
    %137 = arith.mulf %1, %136 : vector<8x128xf32>
    %c31 = arith.constant 31 : index
    %138 = memref.load %arg1[%c31] : memref<61xf32, #tpu.memory_space<smem>>
    %139 = vector.broadcast %138 : f32 to vector<8x128xf32>
    %140 = arith.addf %137, %139 : vector<8x128xf32>
    %cst_12 = arith.constant 0.000000e+00 : f32
    %141 = vector.broadcast %cst_12 : f32 to vector<8x128xf32>
    %142 = arith.maximumf %140, %141 : vector<8x128xf32>
    %c51 = arith.constant 51 : index
    %143 = memref.load %arg1[%c51] : memref<61xf32, #tpu.memory_space<smem>>
    %144 = vector.broadcast %143 : f32 to vector<8x128xf32>
    %145 = arith.mulf %142, %144 : vector<8x128xf32>
    %146 = arith.addf %134, %145 : vector<8x128xf32>
    %c12 = arith.constant 12 : index
    %147 = memref.load %arg1[%c12] : memref<61xf32, #tpu.memory_space<smem>>
    %148 = vector.broadcast %147 : f32 to vector<8x128xf32>
    %149 = arith.mulf %1, %148 : vector<8x128xf32>
    %c32 = arith.constant 32 : index
    %150 = memref.load %arg1[%c32] : memref<61xf32, #tpu.memory_space<smem>>
    %151 = vector.broadcast %150 : f32 to vector<8x128xf32>
    %152 = arith.addf %149, %151 : vector<8x128xf32>
    %cst_13 = arith.constant 0.000000e+00 : f32
    %153 = vector.broadcast %cst_13 : f32 to vector<8x128xf32>
    %154 = arith.maximumf %152, %153 : vector<8x128xf32>
    %c52 = arith.constant 52 : index
    %155 = memref.load %arg1[%c52] : memref<61xf32, #tpu.memory_space<smem>>
    %156 = vector.broadcast %155 : f32 to vector<8x128xf32>
    %157 = arith.mulf %154, %156 : vector<8x128xf32>
    %158 = arith.addf %146, %157 : vector<8x128xf32>
    %c13 = arith.constant 13 : index
    %159 = memref.load %arg1[%c13] : memref<61xf32, #tpu.memory_space<smem>>
    %160 = vector.broadcast %159 : f32 to vector<8x128xf32>
    %161 = arith.mulf %1, %160 : vector<8x128xf32>
    %c33 = arith.constant 33 : index
    %162 = memref.load %arg1[%c33] : memref<61xf32, #tpu.memory_space<smem>>
    %163 = vector.broadcast %162 : f32 to vector<8x128xf32>
    %164 = arith.addf %161, %163 : vector<8x128xf32>
    %cst_14 = arith.constant 0.000000e+00 : f32
    %165 = vector.broadcast %cst_14 : f32 to vector<8x128xf32>
    %166 = arith.maximumf %164, %165 : vector<8x128xf32>
    %c53 = arith.constant 53 : index
    %167 = memref.load %arg1[%c53] : memref<61xf32, #tpu.memory_space<smem>>
    %168 = vector.broadcast %167 : f32 to vector<8x128xf32>
    %169 = arith.mulf %166, %168 : vector<8x128xf32>
    %170 = arith.addf %158, %169 : vector<8x128xf32>
    %c14 = arith.constant 14 : index
    %171 = memref.load %arg1[%c14] : memref<61xf32, #tpu.memory_space<smem>>
    %172 = vector.broadcast %171 : f32 to vector<8x128xf32>
    %173 = arith.mulf %1, %172 : vector<8x128xf32>
    %c34 = arith.constant 34 : index
    %174 = memref.load %arg1[%c34] : memref<61xf32, #tpu.memory_space<smem>>
    %175 = vector.broadcast %174 : f32 to vector<8x128xf32>
    %176 = arith.addf %173, %175 : vector<8x128xf32>
    %cst_15 = arith.constant 0.000000e+00 : f32
    %177 = vector.broadcast %cst_15 : f32 to vector<8x128xf32>
    %178 = arith.maximumf %176, %177 : vector<8x128xf32>
    %c54 = arith.constant 54 : index
    %179 = memref.load %arg1[%c54] : memref<61xf32, #tpu.memory_space<smem>>
    %180 = vector.broadcast %179 : f32 to vector<8x128xf32>
    %181 = arith.mulf %178, %180 : vector<8x128xf32>
    %182 = arith.addf %170, %181 : vector<8x128xf32>
    %c15 = arith.constant 15 : index
    %183 = memref.load %arg1[%c15] : memref<61xf32, #tpu.memory_space<smem>>
    %184 = vector.broadcast %183 : f32 to vector<8x128xf32>
    %185 = arith.mulf %1, %184 : vector<8x128xf32>
    %c35 = arith.constant 35 : index
    %186 = memref.load %arg1[%c35] : memref<61xf32, #tpu.memory_space<smem>>
    %187 = vector.broadcast %186 : f32 to vector<8x128xf32>
    %188 = arith.addf %185, %187 : vector<8x128xf32>
    %cst_16 = arith.constant 0.000000e+00 : f32
    %189 = vector.broadcast %cst_16 : f32 to vector<8x128xf32>
    %190 = arith.maximumf %188, %189 : vector<8x128xf32>
    %c55 = arith.constant 55 : index
    %191 = memref.load %arg1[%c55] : memref<61xf32, #tpu.memory_space<smem>>
    %192 = vector.broadcast %191 : f32 to vector<8x128xf32>
    %193 = arith.mulf %190, %192 : vector<8x128xf32>
    %194 = arith.addf %182, %193 : vector<8x128xf32>
    %c16 = arith.constant 16 : index
    %195 = memref.load %arg1[%c16] : memref<61xf32, #tpu.memory_space<smem>>
    %196 = vector.broadcast %195 : f32 to vector<8x128xf32>
    %197 = arith.mulf %1, %196 : vector<8x128xf32>
    %c36 = arith.constant 36 : index
    %198 = memref.load %arg1[%c36] : memref<61xf32, #tpu.memory_space<smem>>
    %199 = vector.broadcast %198 : f32 to vector<8x128xf32>
    %200 = arith.addf %197, %199 : vector<8x128xf32>
    %cst_17 = arith.constant 0.000000e+00 : f32
    %201 = vector.broadcast %cst_17 : f32 to vector<8x128xf32>
    %202 = arith.maximumf %200, %201 : vector<8x128xf32>
    %c56 = arith.constant 56 : index
    %203 = memref.load %arg1[%c56] : memref<61xf32, #tpu.memory_space<smem>>
    %204 = vector.broadcast %203 : f32 to vector<8x128xf32>
    %205 = arith.mulf %202, %204 : vector<8x128xf32>
    %206 = arith.addf %194, %205 : vector<8x128xf32>
    %c17 = arith.constant 17 : index
    %207 = memref.load %arg1[%c17] : memref<61xf32, #tpu.memory_space<smem>>
    %208 = vector.broadcast %207 : f32 to vector<8x128xf32>
    %209 = arith.mulf %1, %208 : vector<8x128xf32>
    %c37 = arith.constant 37 : index
    %210 = memref.load %arg1[%c37] : memref<61xf32, #tpu.memory_space<smem>>
    %211 = vector.broadcast %210 : f32 to vector<8x128xf32>
    %212 = arith.addf %209, %211 : vector<8x128xf32>
    %cst_18 = arith.constant 0.000000e+00 : f32
    %213 = vector.broadcast %cst_18 : f32 to vector<8x128xf32>
    %214 = arith.maximumf %212, %213 : vector<8x128xf32>
    %c57 = arith.constant 57 : index
    %215 = memref.load %arg1[%c57] : memref<61xf32, #tpu.memory_space<smem>>
    %216 = vector.broadcast %215 : f32 to vector<8x128xf32>
    %217 = arith.mulf %214, %216 : vector<8x128xf32>
    %218 = arith.addf %206, %217 : vector<8x128xf32>
    %c18 = arith.constant 18 : index
    %219 = memref.load %arg1[%c18] : memref<61xf32, #tpu.memory_space<smem>>
    %220 = vector.broadcast %219 : f32 to vector<8x128xf32>
    %221 = arith.mulf %1, %220 : vector<8x128xf32>
    %c38 = arith.constant 38 : index
    %222 = memref.load %arg1[%c38] : memref<61xf32, #tpu.memory_space<smem>>
    %223 = vector.broadcast %222 : f32 to vector<8x128xf32>
    %224 = arith.addf %221, %223 : vector<8x128xf32>
    %cst_19 = arith.constant 0.000000e+00 : f32
    %225 = vector.broadcast %cst_19 : f32 to vector<8x128xf32>
    %226 = arith.maximumf %224, %225 : vector<8x128xf32>
    %c58 = arith.constant 58 : index
    %227 = memref.load %arg1[%c58] : memref<61xf32, #tpu.memory_space<smem>>
    %228 = vector.broadcast %227 : f32 to vector<8x128xf32>
    %229 = arith.mulf %226, %228 : vector<8x128xf32>
    %230 = arith.addf %218, %229 : vector<8x128xf32>
    %c19 = arith.constant 19 : index
    %231 = memref.load %arg1[%c19] : memref<61xf32, #tpu.memory_space<smem>>
    %232 = vector.broadcast %231 : f32 to vector<8x128xf32>
    %233 = arith.mulf %1, %232 : vector<8x128xf32>
    %c39 = arith.constant 39 : index
    %234 = memref.load %arg1[%c39] : memref<61xf32, #tpu.memory_space<smem>>
    %235 = vector.broadcast %234 : f32 to vector<8x128xf32>
    %236 = arith.addf %233, %235 : vector<8x128xf32>
    %cst_20 = arith.constant 0.000000e+00 : f32
    %237 = vector.broadcast %cst_20 : f32 to vector<8x128xf32>
    %238 = arith.maximumf %236, %237 : vector<8x128xf32>
    %c59 = arith.constant 59 : index
    %239 = memref.load %arg1[%c59] : memref<61xf32, #tpu.memory_space<smem>>
    %240 = vector.broadcast %239 : f32 to vector<8x128xf32>
    %241 = arith.mulf %238, %240 : vector<8x128xf32>
    %242 = arith.addf %230, %241 : vector<8x128xf32>
    %c0_21 = arith.constant 0 : index
    %c0_22 = arith.constant 0 : index
    %243 = vector.load %arg3[%c0_21, %c0_22] : memref<8x128xf32, #tpu.memory_space<vmem>>, vector<8x128xf32>
    tpu.vector_store %arg3[%c0_21, %c0_22], %242 {strides = array<i32>} : memref<8x128xf32, #tpu.memory_space<vmem>>, vector<8x128xf32>,
    return
  }
  func.func @transform_0(%arg0: i32, %arg1: memref<61xf32, #tpu.memory_space<smem>>) -> (i32, i32) {
    %c0_i32 = arith.constant 0 : i32
    %c0_i32_0 = arith.constant 0 : i32
    return %arg0, %c0_i32 : i32, i32
  }
  func.func @transform_1(%arg0: i32, %arg1: memref<61xf32, #tpu.memory_space<smem>>) -> (i32, i32) {
    %c0_i32 = arith.constant 0 : i32
    %c0_i32_0 = arith.constant 0 : i32
    return %arg0, %c0_i32 : i32, i32
  }
}

</mosaic_0001>

<bundles_post_ra>
// kernel: net_forward.1
= control target key start
LH: loop header
LB: loop body
LE: loop exit
PB: predicated region body
PF: predicated region fallthrough
CT: control target
= control target key end

     0   :  { %s576_s0 = inlined_call_operand.vmem [shape: f32[61], index: 0, kind: input, shape index: {}]   ;;  %s577_s1 = inlined_call_operand.vmem [shape: f32[8,128], index: 1, kind: input, shape index: {}]   ;;  %s578_s2 = inlined_call_operand.hbm [shape: f32[8,128], index: 2, kind: output, shape index: {}]  }
   0x1   :  { %s7_s11 = sshll.u32 %s576_s0, 4  ;;  %s8_s11 = int_to_ptr.vmem [resolvable:$true] %s7_s11 }
   0x2   :  { %s316_s12 = scalar_lea.vmem %s8_s11, 16  ;;  %p321_p1 = scmp.lt.s32.totalorder %s8_s11, %s8_s11 }
   0x3   :  { %p317_p0 = scmp.ne.s32.totalorder %s8_s11, %s316_s12  ;;  %p322_p2 = scmp.lt.s32.totalorder %s316_s12, %s316_s12 }
   0x5   :  { %p323_p3 = por %p322_p2, %p321_p1 }
   0x7   :  { %p324_p4 = pnand %p323_p3, %p317_p0 }
   0x9   :  { %327 = shalt.err (!%p324_p4)  }
   0xa   :  { %s354_s13 = smov [#allocation3]  }
   0xb   :  { %10 = dma.vmem_to_smem %s8_s11, 16, %s354_s13, [#allocation2] }
   0xc   :  { %350 = dma.done.wait [#allocation2], 16 }
   0xd   :  { %351 = vsyncadd [#allocation2], 4294967280 }
   0xe   :  { %12 = sfence }
   0xf   :  { %13 = vsyncpa [#allocation5], 0  ;;  %s374_s14 = sld [smem:[#allocation3 + $0x3c]]  ;;  %s19_s15 = sld [smem:[#allocation3]]  ;;  %v385_v0 = vld [vmem:[%s577_s1] sm:$0xff] }
  0x10   :  { %s255_s16 = sld [smem:[#allocation3 + $0x14]]  ;;  %s376_s17 = sld [smem:[#allocation3 + $0x28]] }
  0x11   :  { %s257_s0 = sld [smem:[#allocation3 + $0x1]]  ;;  %s258_s18 = sld [smem:[#allocation3 + $0x15]] }
  0x12   :  { %s378_s19 = sld [smem:[#allocation3 + $0x29]]  ;;  %s260_s20 = sld [smem:[#allocation3 + $0x2]] }
  0x13   :  { %s380_s21 = sld [smem:[#allocation3 + $0x16]]  ;;  %s387_s24 = sld [smem:[#allocation3 + $0x2a]] }
  0x14   :  { %s263_s25 = sld [smem:[#allocation3 + $0x3]]  ;;  %s389_s26 = sld [smem:[#allocation3 + $0x17]] }
  0x15   :  { %s391_s27 = sld [smem:[#allocation3 + $0x2b]]  ;;  %v20_v1 = vstv %s19_s15  ;;  %s393_s28 = sld [smem:[#allocation3 + $0x4]]  ;;  %v18_v5 = vstv %s374_s14 }
  0x16   :  { %v23_v2 = vstv %s255_s16  ;;  %s395_s29 = sld [smem:[#allocation3 + $0x18]]  ;;  %v21_v3 = vmul.f32 %v20_v1, %v385_v0  ;;  %s398_s1 = sld [smem:[#allocation3 + $0x5]]  ;;  %v27_v9 = vstv %s376_s17 }
  0x17   :  { %v31_v4 = vstv %s257_s0  ;;  %v34_v7 = vstv %s258_s18  ;;  %s402_s30 = sld [smem:[#allocation3 + $0x2c]]  ;;  %s404_s3 = sld [smem:[#allocation3 + $0x19]] }
  0x18   :  { %v32_v6 = vmul.f32 %v31_v4, %v385_v0  ;;  %v24_v8 = vadd.f32 %v23_v2, %v21_v3  ;;  %v42_v10 = vstv %s260_s20  ;;  %s408_s4 = sld [smem:[#allocation3 + $0x6]]  ;;  %s410_s5 = sld [smem:[#allocation3 + $0x1a]]  ;;  %v38_v13 = vstv %s378_s19 }
  0x19   :  { %v45_v11 = vstv %s380_s21  ;;  %v43_v14 = vmul.f32 %v42_v10, %v385_v0  ;;  %s414_s6 = sld [smem:[#allocation3 + $0x2d]]  ;;  %s416_s7 = sld [smem:[#allocation3 + $0x7]]  ;;  %v49_v17 = vstv %s387_s24 }
  0x1a   :  { %v35_v12 = vadd.f32 %v34_v7, %v32_v6  ;;  %v53_v15 = vstv %s263_s25  ;;  %v25_v16 = vmax.f32 %v24_v8, 0.0  ;;  %v56_v19 = vstv %s389_s26  ;;  %s421_s8 = sld [smem:[#allocation3 + $0x2e]]  ;;  %s423_s9 = sld [smem:[#allocation3 + $0x1b]] }
  0x1b   :  { %v54_v18 = vmul.f32 %v53_v15, %v385_v0  ;;  %v46_v21 = vadd.f32 %v45_v11, %v43_v14  ;;  %v64_v22 = vstv %s393_s28  ;;  %s427_s10 = sld [smem:[#allocation3 + $0x8]]  ;;  %s429_s11 = sld [smem:[#allocation3 + $0x1c]]  ;;  %v60_v26 = vstv %s391_s27 }
  0x1c   :  { %v36_v20 = vmax.f32 %v35_v12, 0.0  ;;  %v67_v23 = vstv %s395_s29  ;;  %v28_v24 = vmul.f32 %v27_v9, %v25_v16  ;;  %v65_v27 = vmul.f32 %v64_v22, %v385_v0  ;;  %s433_s12 = sld [smem:[#allocation3 + $0x2f]]  ;;  %s437_s13 = sld [smem:[#allocation3 + $0x9]] }
  0x1d   :  { %v57_v25 = vadd.f32 %v56_v19, %v54_v18  ;;  %v47_v29 = vmax.f32 %v46_v21, 0.0  ;;  %v75_v30 = vstv %s398_s1  ;;  %v78_v31 = vstv %s404_s3  ;;  %s439_s14 = sld [smem:[#allocation3 + $0x1d]]  ;;  %s442_s15 = sld [smem:[#allocation3 + $0x30]] }
  0x1e   :  { %v39_v28 = vmul.f32 %v38_v13, %v36_v20  ;;  %v29_v32 = vadd.f32 %v28_v24, %v18_v5  ;;  %v68_v34 = vadd.f32 %v67_v23, %v65_v27  ;;  %v76_v35 = vmul.f32 %v75_v30, %v385_v0  ;;  %s447_s16 = sld [smem:[#allocation3 + $0xa]]  ;;  %s449_s17 = sld [smem:[#allocation3 + $0x1e]] }
  0x1f   :  { %v58_v33 = vmax.f32 %v57_v25, 0.0  ;;  %v50_v36 = vmul.f32 %v49_v17, %v47_v29  ;;  %v71_v37 = vstv %s402_s30  ;;  %v86_v38 = vstv %s408_s4  ;;  %s451_s0 = sld [smem:[#allocation3 + $0x31]]  ;;  %s457_s18 = sld [smem:[#allocation3 + $0xb]] }
  0x20   :  { %v89_v39 = vstv %s410_s5  ;;  %v40_v40 = vadd.f32 %v39_v28, %v29_v32  ;;  %v69_v42 = vmax.f32 %v68_v34, 0.0  ;;  %v79_v43 = vadd.f32 %v78_v31, %v76_v35  ;;  %s459_s19 = sld [smem:[#allocation3 + $0x1f]]  ;;  %s462_s20 = sld [smem:[#allocation3 + $0x32]] }
  0x21   :  { %v61_v41 = vmul.f32 %v60_v26, %v58_v33  ;;  %v82_v44 = vstv %s414_s6  ;;  %v87_v45 = vmul.f32 %v86_v38, %v385_v0  ;;  %v97_v46 = vstv %s416_s7  ;;  %s467_s21 = sld [smem:[#allocation3 + $0xc]]  ;;  %s469_s22 = sld [smem:[#allocation3 + $0x20]] }
  0x22   :  { %v100_v47 = vstv %s423_s9  ;;  %v51_v48 = vadd.f32 %v50_v36, %v40_v40  ;;  %v72_v49 = vmul.f32 %v71_v37, %v69_v42  ;;  %v80_v50 = vmax.f32 %v79_v43, 0.0  ;;  %s472_s23 = sld [smem:[#allocation3 + $0x33]]  ;;  %s477_s24 = sld [smem:[#allocation3 + $0xd]] }
  0x23   :  { %v98_v51 = vmul.f32 %v97_v46, %v385_v0  ;;  %v90_v52 = vadd.f32 %v89_v39, %v87_v45  ;;  %v93_v53 = vstv %s421_s8  ;;  %v108_v54 = vstv %s427_s10  ;;  %s479_s25 = sld [smem:[#allocation3 + $0x21]]  ;;  %s482_s26 = sld [smem:[#allocation3 + $0x34]] }
  0x24   :  { %v111_v55 = vstv %s429_s11  ;;  %v62_v56 = vadd.f32 %v61_v41, %v51_v48  ;;  %v83_v57 = vmul.f32 %v82_v44, %v80_v50  ;;  %v109_v59 = vmul.f32 %v108_v54, %v385_v0  ;;  %s487_s27 = sld [smem:[#allocation3 + $0xe]]  ;;  %s489_s28 = sld [smem:[#allocation3 + $0x22]] }
  0x25   :  { %v101_v58 = vadd.f32 %v100_v47, %v98_v51  ;;  %v91_v60 = vmax.f32 %v90_v52, 0.0  ;;  %v104_v61 = vstv %s433_s12  ;;  %v119_v62 = vstv %s437_s13  ;;  %s491_s29 = sld [smem:[#allocation3 + $0x35]]  ;;  %s497_s1 = sld [smem:[#allocation3 + $0xf]] }
  0x26   :  { %v122_v63 = vstv %s439_s14  ;;  %v73_v1 = vadd.f32 %v72_v49, %v62_v56  ;;  %v112_v3 = vadd.f32 %v111_v55, %v109_v59  ;;  %v120_v4 = vmul.f32 %v119_v62, %v385_v0  ;;  %s499_s30 = sld [smem:[#allocation3 + $0x23]]  ;;  %s502_s3 = sld [smem:[#allocation3 + $0x36]] }
  0x27   :  { %v102_v2 = vmax.f32 %v101_v58, 0.0  ;;  %v94_v5 = vmul.f32 %v93_v53, %v91_v60  ;;  %v115_v6 = vstv %s442_s15  ;;  %v130_v7 = vstv %s447_s16  ;;  %s507_s4 = sld [smem:[#allocation3 + $0x10]]  ;;  %s509_s5 = sld [smem:[#allocation3 + $0x24]] }
  0x28   :  { %v133_v8 = vstv %s449_s17  ;;  %v84_v9 = vadd.f32 %v83_v57, %v73_v1  ;;  %v113_v11 = vmax.f32 %v112_v3, 0.0  ;;  %v123_v12 = vadd.f32 %v122_v63, %v120_v4  ;;  %s512_s6 = sld [smem:[#allocation3 + $0x37]]  ;;  %s517_s7 = sld [smem:[#allocation3 + $0x11]] }
  0x29   :  { %v105_v10 = vmul.f32 %v104_v61, %v102_v2  ;;  %v126_v13 = vstv %s451_s0  ;;  %v131_v14 = vmul.f32 %v130_v7, %v385_v0  ;;  %v141_v15 = vstv %s457_s18  ;;  %s519_s8 = sld [smem:[#allocation3 + $0x25]]  ;;  %s522_s9 = sld [smem:[#allocation3 + $0x38]] }
  0x2a   :  { %v144_v16 = vstv %s459_s19  ;;  %v95_v17 = vadd.f32 %v94_v5, %v84_v9  ;;  %v116_v18 = vmul.f32 %v115_v6, %v113_v11  ;;  %v124_v19 = vmax.f32 %v123_v12, 0.0  ;;  %s527_s10 = sld [smem:[#allocation3 + $0x12]]  ;;  %s529_s11 = sld [smem:[#allocation3 + $0x26]] }
  0x2b   :  { %v142_v20 = vmul.f32 %v141_v15, %v385_v0  ;;  %v134_v21 = vadd.f32 %v133_v8, %v131_v14  ;;  %v137_v22 = vstv %s462_s20  ;;  %v152_v23 = vstv %s467_s21  ;;  %s531_s12 = sld [smem:[#allocation3 + $0x39]]  ;;  %s537_s13 = sld [smem:[#allocation3 + $0x13]] }
  0x2c   :  { %v155_v24 = vstv %s469_s22  ;;  %v106_v25 = vadd.f32 %v105_v10, %v95_v17  ;;  %v127_v26 = vmul.f32 %v126_v13, %v124_v19  ;;  %v153_v28 = vmul.f32 %v152_v23, %v385_v0  ;;  %s539_s14 = sld [smem:[#allocation3 + $0x27]]  ;;  %s546_s15 = sld [smem:[#allocation3 + $0x3a]] }
  0x2d   :  { %v145_v27 = vadd.f32 %v144_v16, %v142_v20  ;;  %v135_v29 = vmax.f32 %v134_v21, 0.0  ;;  %v148_v30 = vstv %s472_s23  ;;  %v163_v31 = vstv %s477_s24  ;;  %s551_s16 = sld [smem:[#allocation3 + $0x3b]]  ;;  %s355_s17 = smov [#allocation4]  }
  0x2e   :  { %v166_v32 = vstv %s479_s25  ;;  %v117_v33 = vadd.f32 %v116_v18, %v106_v25  ;;  %v156_v35 = vadd.f32 %v155_v24, %v153_v28  ;;  %v164_v36 = vmul.f32 %v163_v31, %v385_v0  ;;  %s246_s0 = sshll.u32 %s355_s17, 4  ;;  %s247_s0 = int_to_ptr.vmem [resolvable:$true] %s246_s0 }
  0x2f   :  { %v146_v34 = vmax.f32 %v145_v27, 0.0  ;;  %v138_v37 = vmul.f32 %v137_v22, %v135_v29  ;;  %v159_v38 = vstv %s482_s26  ;;  %v174_v39 = vstv %s487_s27  ;;  %s328_s18 = scalar_lea.vmem %s247_s0, 128  ;;  %p333_p6 = scmp.lt.s32.totalorder %s247_s0, %s247_s0 }
  0x30   :  { %v177_v40 = vstv %s489_s28  ;;  %v128_v41 = vadd.f32 %v127_v26, %v117_v33  ;;  %v157_v43 = vmax.f32 %v156_v35, 0.0  ;;  %v167_v44 = vadd.f32 %v166_v32, %v164_v36  ;;  %p329_p5 = scmp.ne.s32.totalorder %s247_s0, %s328_s18  ;;  %p334_p7 = scmp.lt.s32.totalorder %s328_s18, %s328_s18 }
  0x31   :  { %v149_v42 = vmul.f32 %v148_v30, %v146_v34  ;;  %v170_v45 = vstv %s491_s29  ;;  %v175_v46 = vmul.f32 %v174_v39, %v385_v0  ;;  %v185_v47 = vstv %s497_s1 }
  0x32   :  { %v188_v48 = vstv %s499_s30  ;;  %v139_v49 = vadd.f32 %v138_v37, %v128_v41  ;;  %v160_v50 = vmul.f32 %v159_v38, %v157_v43  ;;  %v168_v51 = vmax.f32 %v167_v44, 0.0  ;;  %p335_p8 = por %p334_p7, %p333_p6 }
  0x33   :  { %v186_v52 = vmul.f32 %v185_v47, %v385_v0  ;;  %v178_v53 = vadd.f32 %v177_v40, %v175_v46  ;;  %v181_v54 = vstv %s502_s3  ;;  %v196_v55 = vstv %s507_s4 }
  0x34   :  { %v199_v56 = vstv %s509_s5  ;;  %v150_v57 = vadd.f32 %v149_v42, %v139_v49  ;;  %v171_v58 = vmul.f32 %v170_v45, %v168_v51  ;;  %v197_v60 = vmul.f32 %v196_v55, %v385_v0  ;;  %p336_p9 = pnand %p335_p8, %p329_p5 }
  0x35   :  { %v189_v59 = vadd.f32 %v188_v48, %v186_v52  ;;  %v179_v61 = vmax.f32 %v178_v53, 0.0  ;;  %v192_v62 = vstv %s512_s6  ;;  %v207_v63 = vstv %s517_s7 }
  0x36   :  { %v210_v1 = vstv %s519_s8  ;;  %v161_v2 = vadd.f32 %v160_v50, %v150_v57  ;;  %v200_v4 = vadd.f32 %v199_v56, %v197_v60  ;;  %v208_v5 = vmul.f32 %v207_v63, %v385_v0 }
  0x37   :  { %v190_v3 = vmax.f32 %v189_v59, 0.0  ;;  %v182_v6 = vmul.f32 %v181_v54, %v179_v61  ;;  %v203_v7 = vstv %s522_s9  ;;  %v218_v8 = vstv %s527_s10 }
  0x38   :  { %v221_v9 = vstv %s529_s11  ;;  %v172_v10 = vadd.f32 %v171_v58, %v161_v2  ;;  %v201_v12 = vmax.f32 %v200_v4, 0.0  ;;  %v211_v13 = vadd.f32 %v210_v1, %v208_v5 }
  0x39   :  { %v193_v11 = vmul.f32 %v192_v62, %v190_v3  ;;  %v214_v14 = vstv %s531_s12  ;;  %v219_v15 = vmul.f32 %v218_v8, %v385_v0  ;;  %v229_v16 = vstv %s537_s13 }
  0x3a   :  { %v232_v17 = vstv %s539_s14  ;;  %v183_v18 = vadd.f32 %v182_v6, %v172_v10  ;;  %v204_v19 = vmul.f32 %v203_v7, %v201_v12  ;;  %v212_v20 = vmax.f32 %v211_v13, 0.0 }
  0x3b   :  { %v230_v21 = vmul.f32 %v229_v16, %v385_v0  ;;  %v222_v22 = vadd.f32 %v221_v9, %v219_v15  ;;  %v225_v25 = vstv %s546_s15  ;;  %v236_v28 = vstv %s551_s16 }
  0x3c   :  { %v194_v23 = vadd.f32 %v193_v11, %v183_v18  ;;  %v215_v24 = vmul.f32 %v214_v14, %v212_v20 }
  0x3d   :  { %v233_v26 = vadd.f32 %v232_v17, %v230_v21  ;;  %v223_v27 = vmax.f32 %v222_v22, 0.0 }
  0x3e   :  { %v205_v29 = vadd.f32 %v204_v19, %v194_v23 }
  0x3f   :  { %v234_v30 = vmax.f32 %v233_v26, 0.0  ;;  %v226_v31 = vmul.f32 %v225_v25, %v223_v27 }
  0x40   :  { %v216_v32 = vadd.f32 %v215_v24, %v205_v29 }
  0x41   :  { %v237_v33 = vmul.f32 %v236_v28, %v234_v30 }
  0x42   :  { %v227_v34 = vadd.f32 %v226_v31, %v216_v32 }
  0x44   :  { %v238_v35 = vadd.f32 %v237_v33, %v227_v34 }
  0x46   :  { %239 = vst [vmem:[#allocation4] sm:$0xff] %v238_v35 }
  0x47   :  { %339 = shalt.err (!%p336_p9)
}
  0x48   :  { %s340_s21 = scalar_lea.hbm %s578_s2, 128 }
  0x49   :  { %p341_p10 = scmp.ne.s32.totalorder %s578_s2, %s340_s21  ;;  %p344_p11 = scmp.lt.u32.totalorder %s340_s21, %s578_s2 }
  0x4b   :  { %p346_p12 = pnand %p344_p11, %p341_p10 }
  0x4d   :  { %349 = shalt.err (!%p346_p12)
}
  0x4e   :  { %249 = dma.vmem_to_hbm [thread:$0]  %s247_s0, 128, %s578_s2, [#allocation5]  }
  0x4f   :  { %352 = dma.done.wait [#allocation5], 128  }
  0x50   :  { %353 = vsyncadd [#allocation5], 4294967168 }
  0x51   :  { %253 = vsyncpa [#allocation5], 1 }

</bundles_post_ra>
